<compile_context>
chip_gen: v7x
topology: tpu7x:2x2x1
jax: 0.10.0
libtpu: 0.0.40
codegen_flags: <defaults>
</compile_context>

<pallas_src>
import functools

import jax
import jax.numpy as jnp
import numpy as np
from jax.experimental import pallas as pl
from jax.experimental.pallas import tpu as pltpu


def _round_up(v, m):
    return (v + m - 1) // m * m


def _make_tap_masks(H, W, kh, kw, ph, pw, n_images):
    """mask[t, n*H*W + h*W + w] = 1 iff source pixel (h+di-ph, w+dj-pw) lies inside
    the image for tap t = di*kw + dj.  Implements the conv's zero padding and also
    kills the pltpu.roll wrap-around (which only occurs on border pixels)."""
    T = kh * kw
    m = np.zeros((T, H * W), np.float32)
    for di in range(kh):
        for dj in range(kw):
            hs = np.arange(H) + di - ph
            ws = np.arange(W) + dj - pw
            vh = ((hs >= 0) & (hs < H)).astype(np.float32)
            vw = ((ws >= 0) & (ws < W)).astype(np.float32)
            m[di * kw + dj] = (vh[:, None] * vw[None, :]).reshape(-1)
    trivial = tuple(bool(np.all(m[t] == 1.0)) for t in range(T))
    return np.tile(m, (1, n_images)), trivial


def _spectral_normalize(w, u, eps=1e-12):
    """One manual power-iteration step (SpectralNormManual.compute_weight);
    returns w / sigma.  Weight-sized -> hoisted to the wrapper, not the kernel."""
    wm = w.reshape(w.shape[0], -1)                        # (O, K)
    v = wm.T @ u                                          # (K, 1)
    v = v * jax.lax.rsqrt(jnp.sum(v * v) + eps)
    wv = wm @ v                                           # (O, 1)
    un = wv * jax.lax.rsqrt(jnp.sum(wv * wv) + eps)
    sigma = jnp.sum(un * wv)                              # u'^T W v
    return w / jnp.maximum(sigma, eps)
    # TODO(synk): training-time update of the `u` buffer is not propagated.


def _stack_taps(w, out_p, in_p):
    """(O, C, kh, kw) -> (out_p, kh*kw*in_p): row o, column t*in_p + c holds
    w[o, c, di, dj] with t = di*kw + dj; zero-padded to 8-aligned channel counts."""
    O, C, kh, kw = w.shape
    wp = jnp.pad(w, ((0, out_p - O), (0, in_p - C), (0, 0), (0, 0)))
    return jnp.transpose(wp, (0, 2, 3, 1)).reshape(out_p, kh * kw * in_p)


def _conv_block_kernel(x_ref, w1_ref, b1_ref, w2_ref, b2_ref, masks_ref, o_ref,
                       *, shifts, trivial_mask, lanes, negative_slope):
    """Fused: conv1 (single MXU dot) -> lrelu -> conv2 (single MXU dot) -> lrelu.
    Activations are channel-major (C, lanes) with batch folded into lanes."""
    masks = masks_ref[...]                                # (T, lanes)

    def sn_conv_lrelu(act, w_ref, b_ref):
        # Build the stacked, masked, shifted RHS (T*C, lanes) in VMEM, then ONE
        # (O, T*C) @ (T*C, lanes) matmul with f32 accumulation on the MXU.
        parts = []
        for t, s in enumerate(shifts):
            k = (-s) % lanes                              # static lane rotation
            r = act if k == 0 else pltpu.roll(act, shift=k, axis=1)
            if not trivial_mask[t]:
                r = r * masks[t:t + 1, :]                 # zero out-of-image taps
            parts.append(r)
        rhs = jnp.concatenate(parts, axis=0)              # (T*C, lanes)
        out = jnp.dot(w_ref[...], rhs,
                      preferred_element_type=jnp.float32) + b_ref[...]
        return jnp.where(out >= 0, out, negative_slope * out)

    h1 = sn_conv_lrelu(x_ref[...], w1_ref, b1_ref)        # stays in VMEM
    o_ref[...] = sn_conv_lrelu(h1, w2_ref, b2_ref).astype(o_ref.dtype)


def conv_block(x, params, *, padding=1, negative_slope=0.2, target_lanes=2048):
    """ConvBlock forward (default flags: no residual / self-attention / SE):
    SpectralNormConv2d -> LeakyReLU(0.2) -> SpectralNormConv2d -> LeakyReLU(0.2).
    x: (N, Cin, H, W) f32  ->  (N, Cout, H, W) f32."""
    N, Cin, H, W = x.shape
    HW = H * W
    w1, w2 = params["w1"], params["w2"]
    O1, _, kh, kw = w1.shape
    O2 = w2.shape[0]
    assert w2.shape[2:] == (kh, kw)
    ph = pw = padding
    if (kh - 1) != 2 * ph or (kw - 1) != 2 * pw:
        # TODO(synk): only 'same' convolutions (stride 1, pad = (k-1)/2) supported.
        raise NotImplementedError("only same-size convs (stride=1, pad=(k-1)/2)")
    T = kh * kw

    Cin_p, O1_p, O2_p = _round_up(Cin, 8), _round_up(O1, 8), _round_up(O2, 8)

    # Images per grid step: fold batch into lanes, block lane width ~target_lanes
    # so larger batches still give several pipelined grid steps per core.
    nb = max(1, min(N, target_lanes // HW))
    while N % nb:
        nb -= 1
    if (nb * HW) % 128 != 0:          # multi-step blocks must be lane-tile aligned
        nb = N
    lanes = nb * HW
    n_steps = N // nb

    # ---- wrapper-side prep (weight-sized / metadata only) ----
    w1s = _stack_taps(_spectral_normalize(w1, params["u1"]), O1_p, Cin_p)
    w2s = _stack_taps(_spectral_normalize(w2, params["u2"]), O2_p, O1_p)
    b1 = jnp.pad(params["b1"], (0, O1_p - O1)).reshape(O1_p, 1)
    b2 = jnp.pad(params["b2"], (0, O2_p - O2)).reshape(O2_p, 1)

    # channel-major activation with batch folded into lanes: (Cin_p, N*HW)
    x_cm = jnp.pad(x.reshape(N, Cin, HW), ((0, 0), (0, Cin_p - Cin), (0, 0)))
    x_cm = jnp.transpose(x_cm, (1, 0, 2)).reshape(Cin_p, N * HW)

    masks_np, trivial = _make_tap_masks(H, W, kh, kw, ph, pw, nb)
    masks = jnp.asarray(masks_np)                                  # (T, lanes)
    shifts = tuple((di - ph) * W + (dj - pw)
                   for di in range(kh) for dj in range(kw))

    kernel = functools.partial(
        _conv_block_kernel, shifts=shifts, trivial_mask=trivial,
        lanes=lanes, negative_slope=negative_slope)

    out_cm = pl.pallas_call(
        kernel,
        out_shape=jax.ShapeDtypeStruct((O2_p, N * HW), jnp.float32),
        grid=(n_steps,),
        in_specs=[
            pl.BlockSpec((Cin_p, lanes), lambda i: (0, i)),        # activations
            pl.BlockSpec((O1_p, T * Cin_p), lambda i: (0, 0)),     # stacked W1/sigma1
            pl.BlockSpec((O1_p, 1), lambda i: (0, 0)),             # b1
            pl.BlockSpec((O2_p, T * O1_p), lambda i: (0, 0)),      # stacked W2/sigma2
            pl.BlockSpec((O2_p, 1), lambda i: (0, 0)),             # b2
            pl.BlockSpec((T, lanes), lambda i: (0, 0)),            # border masks
        ],
        out_specs=pl.BlockSpec((O2_p, lanes), lambda i: (0, i)),   # lane-dense store
        compiler_params=pltpu.CompilerParams(
            dimension_semantics=("parallel",)),
    )(x_cm, w1s, b1, w2s, b2, masks)

    # (O2_p, N*HW) -> (N, O2, H, W): drop channel padding; lane axis is n-major.
    return jnp.transpose(out_cm[:O2].reshape(O2, N, H, W), (1, 0, 2, 3))


# ---------------------------------------------------------------------------
if __name__ == "__main__":
    key = jax.random.PRNGKey(0)
    k_w1, k_u1, k_w2, k_u2, k_x = jax.random.split(key, 5)

    # ConvBlock(in_channel=4, out_channel=8, kernel_size=3, padding=1)
    N, Cin, H, W = 2, 4, 16, 16
    Cout, k, p = 8, 3, 1

    def kaiming(rng, shape):                               # kaiming_normal_ (fan_in)
        fan_in = shape[1] * shape[2] * shape[3]
        return jax.random.normal(rng, shape, jnp.float32) * np.sqrt(2.0 / fan_in)

    params = dict(
        w1=kaiming(k_w1, (Cout, Cin, k, k)),
        b1=jnp.zeros((Cout,), jnp.float32),                # bias zeroed at init
        u1=jax.random.normal(k_u1, (Cout, 1), jnp.float32) * 0.1,
        w2=kaiming(k_w2, (Cout, Cout, k, k)),
        b2=jnp.zeros((Cout,), jnp.float32),
        u2=jax.random.normal(k_u2, (Cout, 1), jnp.float32) * 0.1,
    )
    x = jax.random.normal(k_x, (N, Cin, H, W), jnp.float32)

    fwd = jax.jit(functools.partial(conv_block, padding=p))
    out = jax.block_until_ready(fwd(x, params))
    assert out.shape == (N, Cout, H, W)

    # --- pure-JAX reference (manual spectral norm + conv + bias + LeakyReLU) ---
    def ref_sn_conv(xx, w, b, u):
        wm = w.reshape(w.shape[0], -1)
        v = wm.T @ u
        v = v / jnp.linalg.norm(v)
        u2 = wm @ v
        u2 = u2 / jnp.linalg.norm(u2)
        sigma = (u2.T @ wm @ v)[0, 0]
        w_sn = (wm / sigma).reshape(w.shape)
        y = jax.lax.conv_general_dilated(
            xx, w_sn, (1, 1), ((p, p), (p, p)),
            dimension_numbers=("NCHW", "OIHW", "NCHW"))
        return y + b[None, :, None, None]

    r = jax.nn.leaky_relu(ref_sn_conv(x, params["w1"], params["b1"], params["u1"]), 0.2)
    r = jax.nn.leaky_relu(ref_sn_conv(r, params["w2"], params["b2"], params["u2"]), 0.2)

    np.testing.assert_allclose(np.asarray(out), np.asarray(r), rtol=1e-4, atol=1e-4)
    print("KERNEL_OK")
</pallas_src>

<mosaic_0001>
module attributes {stable_mosaic.version = 11 : i64} {
  func.func @_conv_block_kernel(%arg0: i32, %arg1: memref<8x512xf32, #tpu.memory_space<vmem>>, %arg2: memref<8x72xf32, #tpu.memory_space<vmem>>, %arg3: memref<8x1xf32, #tpu.memory_space<vmem>>, %arg4: memref<8x72xf32, #tpu.memory_space<vmem>>, %arg5: memref<8x1xf32, #tpu.memory_space<vmem>>, %arg6: memref<9x512xf32, #tpu.memory_space<vmem>>, %arg7: memref<8x512xf32, #tpu.memory_space<vmem>>) attributes {dimension_semantics = [#tpu.dimension_semantics<parallel>], iteration_bounds = array<i64: 1>, scalar_prefetch = 0 : i64, scratch_operands = 0 : i64, tpu.core_type = #tpu.core_type<tc>, window_params = [{transform_indices = @transform_0, window_bounds = array<i64: 8, 512>}, {pipeline_mode = #tpu.pipeline_mode<synchronous>, transform_indices = @transform_1, window_bounds = array<i64: 8, 72>}, {pipeline_mode = #tpu.pipeline_mode<synchronous>, transform_indices = @transform_2, window_bounds = array<i64: 8, 1>}, {pipeline_mode = #tpu.pipeline_mode<synchronous>, transform_indices = @transform_3, window_bounds = array<i64: 8, 72>}, {pipeline_mode = #tpu.pipeline_mode<synchronous>, transform_indices = @transform_4, window_bounds = array<i64: 8, 1>}, {pipeline_mode = #tpu.pipeline_mode<synchronous>, transform_indices = @transform_5, window_bounds = array<i64: 9, 512>}, {transform_indices = @transform_6, window_bounds = array<i64: 8, 512>}]} {
    %c0 = arith.constant 0 : index
    %c0_0 = arith.constant 0 : index
    %0 = vector.load %arg6[%c0, %c0_0] : memref<9x512xf32, #tpu.memory_space<vmem>>, vector<9x512xf32>
    %c0_1 = arith.constant 0 : index
    %c0_2 = arith.constant 0 : index
    %1 = vector.load %arg1[%c0_1, %c0_2] : memref<8x512xf32, #tpu.memory_space<vmem>>, vector<8x512xf32>
    %c17_i32 = arith.constant 17 : i32
    %2 = tpu.dynamic_rotate %1 by %c17_i32 dim 1 : vector<8x512xf32>, i32 -> vector<8x512xf32>
    %3 = vector.extract_strided_slice %0 {offsets = [0, 0], sizes = [1, 512], strides = [1, 1]} : vector<9x512xf32> to vector<1x512xf32>
    %4 = vector.broadcast %3 : vector<1x512xf32> to vector<8x512xf32>
    %5 = arith.mulf %2, %4 : vector<8x512xf32>
    %c16_i32 = arith.constant 16 : i32
    %6 = tpu.dynamic_rotate %1 by %c16_i32 dim 1 : vector<8x512xf32>, i32 -> vector<8x512xf32>
    %7 = vector.extract_strided_slice %0 {offsets = [1, 0], sizes = [1, 512], strides = [1, 1]} : vector<9x512xf32> to vector<1x512xf32>
    %8 = vector.broadcast %7 : vector<1x512xf32> to vector<8x512xf32>
    %9 = arith.mulf %6, %8 : vector<8x512xf32>
    %c15_i32 = arith.constant 15 : i32
    %10 = tpu.dynamic_rotate %1 by %c15_i32 dim 1 : vector<8x512xf32>, i32 -> vector<8x512xf32>
    %11 = vector.extract_strided_slice %0 {offsets = [2, 0], sizes = [1, 512], strides = [1, 1]} : vector<9x512xf32> to vector<1x512xf32>
    %12 = vector.broadcast %11 : vector<1x512xf32> to vector<8x512xf32>
    %13 = arith.mulf %10, %12 : vector<8x512xf32>
    %c1_i32 = arith.constant 1 : i32
    %14 = tpu.dynamic_rotate %1 by %c1_i32 dim 1 : vector<8x512xf32>, i32 -> vector<8x512xf32>
    %15 = vector.extract_strided_slice %0 {offsets = [3, 0], sizes = [1, 512], strides = [1, 1]} : vector<9x512xf32> to vector<1x512xf32>
    %16 = vector.broadcast %15 : vector<1x512xf32> to vector<8x512xf32>
    %17 = arith.mulf %14, %16 : vector<8x512xf32>
    %c511_i32 = arith.constant 511 : i32
    %18 = tpu.dynamic_rotate %1 by %c511_i32 dim 1 : vector<8x512xf32>, i32 -> vector<8x512xf32>
    %19 = vector.extract_strided_slice %0 {offsets = [5, 0], sizes = [1, 512], strides = [1, 1]} : vector<9x512xf32> to vector<1x512xf32>
    %20 = vector.broadcast %19 : vector<1x512xf32> to vector<8x512xf32>
    %21 = arith.mulf %18, %20 : vector<8x512xf32>
    %c497_i32 = arith.constant 497 : i32
    %22 = tpu.dynamic_rotate %1 by %c497_i32 dim 1 : vector<8x512xf32>, i32 -> vector<8x512xf32>
    %23 = vector.extract_strided_slice %0 {offsets = [6, 0], sizes = [1, 512], strides = [1, 1]} : vector<9x512xf32> to vector<1x512xf32>
    %24 = vector.broadcast %23 : vector<1x512xf32> to vector<8x512xf32>
    %25 = arith.mulf %22, %24 : vector<8x512xf32>
    %c496_i32 = arith.constant 496 : i32
    %26 = tpu.dynamic_rotate %1 by %c496_i32 dim 1 : vector<8x512xf32>, i32 -> vector<8x512xf32>
    %27 = vector.extract_strided_slice %0 {offsets = [7, 0], sizes = [1, 512], strides = [1, 1]} : vector<9x512xf32> to vector<1x512xf32>
    %28 = vector.broadcast %27 : vector<1x512xf32> to vector<8x512xf32>
    %29 = arith.mulf %26, %28 : vector<8x512xf32>
    %c495_i32 = arith.constant 495 : i32
    %30 = tpu.dynamic_rotate %1 by %c495_i32 dim 1 : vector<8x512xf32>, i32 -> vector<8x512xf32>
    %31 = vector.extract_strided_slice %0 {offsets = [8, 0], sizes = [1, 512], strides = [1, 1]} : vector<9x512xf32> to vector<1x512xf32>
    %32 = vector.broadcast %31 : vector<1x512xf32> to vector<8x512xf32>
    %33 = arith.mulf %30, %32 : vector<8x512xf32>
    %34 = tpu.concatenate %5, %9, %13, %17, %1, %21, %25, %29, %33 in 0 : vector<8x512xf32>, vector<8x512xf32>, vector<8x512xf32>, vector<8x512xf32>, vector<8x512xf32>, vector<8x512xf32>, vector<8x512xf32>, vector<8x512xf32>, vector<8x512xf32> -> vector<72x512xf32>
    %c0_3 = arith.constant 0 : index
    %c0_4 = arith.constant 0 : index
    %35 = vector.load %arg2[%c0_3, %c0_4] : memref<8x72xf32, #tpu.memory_space<vmem>>, vector<8x72xf32>
    %cst = arith.constant dense<0.000000e+00> : vector<8x512xf32>
    %36 = tpu.matmul %35, %34, %cst {dimension_numbers = #tpu.dot_dimension_numbers<[1], [0], [0], [1], [0, 0, 1, 1], [], []>} : vector<8x72xf32>, vector<72x512xf32>, vector<8x512xf32> -> vector<8x512xf32>
    %c0_5 = arith.constant 0 : index
    %c0_6 = arith.constant 0 : index
    %37 = vector.load %arg3[%c0_5, %c0_6] : memref<8x1xf32, #tpu.memory_space<vmem>>, vector<8x1xf32>
    %38 = vector.broadcast %37 : vector<8x1xf32> to vector<8x512xf32>
    %39 = arith.addf %36, %38 : vector<8x512xf32>
    %cst_7 = arith.constant 0.000000e+00 : f32
    %40 = vector.broadcast %cst_7 : f32 to vector<8x512xf32>
    %41 = arith.cmpf oge, %39, %40 : vector<8x512xf32>
    %cst_8 = arith.constant 2.000000e-01 : f32
    %42 = vector.broadcast %cst_8 : f32 to vector<8x512xf32>
    %43 = arith.mulf %42, %39 : vector<8x512xf32>
    %44 = arith.select %41, %39, %43 : vector<8x512xi1>, vector<8x512xf32>
    %c17_i32_9 = arith.constant 17 : i32
    %45 = tpu.dynamic_rotate %44 by %c17_i32_9 dim 1 : vector<8x512xf32>, i32 -> vector<8x512xf32>
    %46 = vector.extract_strided_slice %0 {offsets = [0, 0], sizes = [1, 512], strides = [1, 1]} : vector<9x512xf32> to vector<1x512xf32>
    %47 = vector.broadcast %46 : vector<1x512xf32> to vector<8x512xf32>
    %48 = arith.mulf %45, %47 : vector<8x512xf32>
    %c16_i32_10 = arith.constant 16 : i32
    %49 = tpu.dynamic_rotate %44 by %c16_i32_10 dim 1 : vector<8x512xf32>, i32 -> vector<8x512xf32>
    %50 = vector.extract_strided_slice %0 {offsets = [1, 0], sizes = [1, 512], strides = [1, 1]} : vector<9x512xf32> to vector<1x512xf32>
    %51 = vector.broadcast %50 : vector<1x512xf32> to vector<8x512xf32>
    %52 = arith.mulf %49, %51 : vector<8x512xf32>
    %c15_i32_11 = arith.constant 15 : i32
    %53 = tpu.dynamic_rotate %44 by %c15_i32_11 dim 1 : vector<8x512xf32>, i32 -> vector<8x512xf32>
    %54 = vector.extract_strided_slice %0 {offsets = [2, 0], sizes = [1, 512], strides = [1, 1]} : vector<9x512xf32> to vector<1x512xf32>
    %55 = vector.broadcast %54 : vector<1x512xf32> to vector<8x512xf32>
    %56 = arith.mulf %53, %55 : vector<8x512xf32>
    %c1_i32_12 = arith.constant 1 : i32
    %57 = tpu.dynamic_rotate %44 by %c1_i32_12 dim 1 : vector<8x512xf32>, i32 -> vector<8x512xf32>
    %58 = vector.extract_strided_slice %0 {offsets = [3, 0], sizes = [1, 512], strides = [1, 1]} : vector<9x512xf32> to vector<1x512xf32>
    %59 = vector.broadcast %58 : vector<1x512xf32> to vector<8x512xf32>
    %60 = arith.mulf %57, %59 : vector<8x512xf32>
    %c511_i32_13 = arith.constant 511 : i32
    %61 = tpu.dynamic_rotate %44 by %c511_i32_13 dim 1 : vector<8x512xf32>, i32 -> vector<8x512xf32>
    %62 = vector.extract_strided_slice %0 {offsets = [5, 0], sizes = [1, 512], strides = [1, 1]} : vector<9x512xf32> to vector<1x512xf32>
    %63 = vector.broadcast %62 : vector<1x512xf32> to vector<8x512xf32>
    %64 = arith.mulf %61, %63 : vector<8x512xf32>
    %c497_i32_14 = arith.constant 497 : i32
    %65 = tpu.dynamic_rotate %44 by %c497_i32_14 dim 1 : vector<8x512xf32>, i32 -> vector<8x512xf32>
    %66 = vector.extract_strided_slice %0 {offsets = [6, 0], sizes = [1, 512], strides = [1, 1]} : vector<9x512xf32> to vector<1x512xf32>
    %67 = vector.broadcast %66 : vector<1x512xf32> to vector<8x512xf32>
    %68 = arith.mulf %65, %67 : vector<8x512xf32>
    %c496_i32_15 = arith.constant 496 : i32
    %69 = tpu.dynamic_rotate %44 by %c496_i32_15 dim 1 : vector<8x512xf32>, i32 -> vector<8x512xf32>
    %70 = vector.extract_strided_slice %0 {offsets = [7, 0], sizes = [1, 512], strides = [1, 1]} : vector<9x512xf32> to vector<1x512xf32>
    %71 = vector.broadcast %70 : vector<1x512xf32> to vector<8x512xf32>
    %72 = arith.mulf %69, %71 : vector<8x512xf32>
    %c495_i32_16 = arith.constant 495 : i32
    %73 = tpu.dynamic_rotate %44 by %c495_i32_16 dim 1 : vector<8x512xf32>, i32 -> vector<8x512xf32>
    %74 = vector.extract_strided_slice %0 {offsets = [8, 0], sizes = [1, 512], strides = [1, 1]} : vector<9x512xf32> to vector<1x512xf32>
    %75 = vector.broadcast %74 : vector<1x512xf32> to vector<8x512xf32>
    %76 = arith.mulf %73, %75 : vector<8x512xf32>
    %77 = tpu.concatenate %48, %52, %56, %60, %44, %64, %68, %72, %76 in 0 : vector<8x512xf32>, vector<8x512xf32>, vector<8x512xf32>, vector<8x512xf32>, vector<8x512xf32>, vector<8x512xf32>, vector<8x512xf32>, vector<8x512xf32>, vector<8x512xf32> -> vector<72x512xf32>
    %c0_17 = arith.constant 0 : index
    %c0_18 = arith.constant 0 : index
    %78 = vector.load %arg4[%c0_17, %c0_18] : memref<8x72xf32, #tpu.memory_space<vmem>>, vector<8x72xf32>
    %cst_19 = arith.constant dense<0.000000e+00> : vector<8x512xf32>
    %79 = tpu.matmul %78, %77, %cst_19 {dimension_numbers = #tpu.dot_dimension_numbers<[1], [0], [0], [1], [0, 0, 1, 1], [], []>} : vector<8x72xf32>, vector<72x512xf32>, vector<8x512xf32> -> vector<8x512xf32>
    %c0_20 = arith.constant 0 : index
    %c0_21 = arith.constant 0 : index
    %80 = vector.load %arg5[%c0_20, %c0_21] : memref<8x1xf32, #tpu.memory_space<vmem>>, vector<8x1xf32>
    %81 = vector.broadcast %80 : vector<8x1xf32> to vector<8x512xf32>
    %82 = arith.addf %79, %81 : vector<8x512xf32>
    %cst_22 = arith.constant 0.000000e+00 : f32
    %83 = vector.broadcast %cst_22 : f32 to vector<8x512xf32>
    %84 = arith.cmpf oge, %82, %83 : vector<8x512xf32>
    %cst_23 = arith.constant 2.000000e-01 : f32
    %85 = vector.broadcast %cst_23 : f32 to vector<8x512xf32>
    %86 = arith.mulf %85, %82 : vector<8x512xf32>
    %87 = arith.select %84, %82, %86 : vector<8x512xi1>, vector<8x512xf32>
    %c0_24 = arith.constant 0 : index
    %c0_25 = arith.constant 0 : index
    %88 = vector.load %arg7[%c0_24, %c0_25] : memref<8x512xf32, #tpu.memory_space<vmem>>, vector<8x512xf32>
    tpu.vector_store %arg7[%c0_24, %c0_25], %87 {strides = array<i32>} : memref<8x512xf32, #tpu.memory_space<vmem>>, vector<8x512xf32>,
    return
  }
  func.func @transform_0(%arg0: i32) -> (i32, i32) {
    %c0_i32 = arith.constant 0 : i32
    %c0_i32_0 = arith.constant 0 : i32
    return %c0_i32, %arg0 : i32, i32
  }
  func.func @transform_1(%arg0: i32) -> (i32, i32) {
    %c0_i32 = arith.constant 0 : i32
    %c0_i32_0 = arith.constant 0 : i32
    %c0_i32_1 = arith.constant 0 : i32
    return %c0_i32, %c0_i32_0 : i32, i32
  }
  func.func @transform_2(%arg0: i32) -> (i32, i32) {
    %c0_i32 = arith.constant 0 : i32
    %c0_i32_0 = arith.constant 0 : i32
    %c0_i32_1 = arith.constant 0 : i32
    return %c0_i32, %c0_i32_0 : i32, i32
  }
  func.func @transform_3(%arg0: i32) -> (i32, i32) {
    %c0_i32 = arith.constant 0 : i32
    %c0_i32_0 = arith.constant 0 : i32
    %c0_i32_1 = arith.constant 0 : i32
    return %c0_i32, %c0_i32_0 : i32, i32
  }
  func.func @transform_4(%arg0: i32) -> (i32, i32) {
    %c0_i32 = arith.constant 0 : i32
    %c0_i32_0 = arith.constant 0 : i32
    %c0_i32_1 = arith.constant 0 : i32
    return %c0_i32, %c0_i32_0 : i32, i32
  }
  func.func @transform_5(%arg0: i32) -> (i32, i32) {
    %c0_i32 = arith.constant 0 : i32
    %c0_i32_0 = arith.constant 0 : i32
    %c0_i32_1 = arith.constant 0 : i32
    return %c0_i32, %c0_i32_0 : i32, i32
  }
  func.func @transform_6(%arg0: i32) -> (i32, i32) {
    %c0_i32 = arith.constant 0 : i32
    %c0_i32_0 = arith.constant 0 : i32
    return %c0_i32, %arg0 : i32, i32
  }
}

</mosaic_0001>

<bundles_post_ra>
// kernel: conv_block.1
= control target key start
LH: loop header
LB: loop body
LE: loop exit
PB: predicated region body
PF: predicated region fallthrough
CT: control target
= control target key end

     0   :  { %s849_s25 = smov 17   ;;  %s850_s30 = smov 16   ;;  %v856_v4 = vmov 0.0   ;;  %v857_v5 = vmov 0   ;;  %v43_v7 = vlaneseq  ;;  %vm308_vm8 = vcmask 588800   ;;  %s1425_s0 = inlined_call_operand.vmem [shape: f32[8,512], index: 0, kind: input, shape index: {}]   ;;  %s1426_s2 = inlined_call_operand.vmem [shape: f32[8,1], index: 2, kind: input, shape index: {}]   ;;  %s1427_s5 = inlined_call_operand.vmem [shape: f32[9,512], index: 5, kind: input, shape index: {}]   ;;  %s1428_s1 = inlined_call_operand.vmem [shape: f32[8,72], index: 1, kind: input, shape index: {}]   ;;  %s1429_s4 = inlined_call_operand.vmem [shape: f32[8,1], index: 4, kind: input, shape index: {}]   ;;  %s1430_s3 = inlined_call_operand.vmem [shape: f32[8,72], index: 3, kind: input, shape index: {}]   ;;  %s1431_s6 = inlined_call_operand.vmem [shape: f32[8,512], index: 6, kind: output, shape index: {}]  }
   0x1   :  { %v897_v0 = vld [vmem:[%s1425_s0 + $0x10] sm:$0xff]  ;;  %v902_v1 = vld [vmem:[%s1425_s0] sm:$0xff]  ;;  %v911_v2 = vld [vmem:[%s1425_s0 + $0x18] sm:$0xff]  ;;  %s852_s7 = smov 1   ;;  %s853_s8 = smov 127   ;;  %376 = vmatprep.mubr.f32.mxu0 %v856_v4  ;;  %447 = vmatprep.mubr.f32.mxu1 %v856_v4 }
   0x2   :  { %39 = vrot.lane.b32.xlu1 %v897_v0, %s849_s25  ;;  %35 = vrot.lane.b32.xlu0 %v902_v1, %s849_s25  ;;  %v916_v3 = vld [vmem:[%s1425_s0 + $0x8] sm:$0xff]  ;;  %s851_s0 = smov 15   ;;  %s854_s9 = smov 113   ;;  %v302_v6 = vld [vmem:[%s1426_s2] sm:$0xff]  ;;  %v983_v8 = vshrl.u32 %v43_v7, 7  ;;  %v985_v11 = vand.u32 127, %v43_v7 }
   0x3   :  { %s855_s10 = smov 112   ;;  %848 = vset.pattern.permute.xlu0 %v857_v5  ;;  %s858_s11 = smov 111   ;;  %v992_v14 = vld [vmem:[%s1427_s5 + $0x8] sm:$0xff]  ;;  %v998_v17 = vld [vmem:[%s1427_s5] sm:$0xff]  ;;  %v1003_v18 = vld [vmem:[%s1427_s5 + $0x10] sm:$0xff] }
   0x4   :  { %v52_v12 = vsub.s32 0, %v983_v8  ;;  %v85_v13 = vsub.s32 1, %v983_v8  ;;  %vm45_vm0 = vcmp.lt.s32.totalorder %v985_v11, 17  ;;  %vm78_vm1 = vcmp.lt.s32.totalorder %v985_v11, 16  ;;  %v1015_v21 = vld [vmem:[%s1427_s5 + $0x18] sm:$0xff] }
   0x5   :  { %v118_v54 = vsub.s32 2, %v983_v8  ;;  %v151_v55 = vsub.s32 3, %v983_v8  ;;  %vm111_vm2 = vcmp.lt.s32.totalorder %v985_v11, 15  ;;  %vm144_vm3 = vcmp.lt.s32.totalorder %v985_v11, 1 }
   0x6   :  { %41 = vrot.lane.b32.xlu1 %v911_v2, %s849_s25  ;;  %37 = vrot.lane.b32.xlu0 %v916_v3, %s849_s25  ;;  %v1007_v19 = vrot.slane %v992_v14, %v52_v12  ;;  %v1010_v20 = vrot.slane %v992_v14, %v85_v13  ;;  %v1020_v23 = vrot.slane %v998_v17, %v52_v12  ;;  %vm177_vm4 = vcmp.lt.s32.totalorder %v985_v11, 127 }
   0x7   :  { %v1023_v24 = vrot.slane %v1003_v18, %v52_v12  ;;  %v1026_v27 = vrot.slane %v998_v17, %v85_v13  ;;  %v1033_v30 = vrot.slane %v1003_v18, %v85_v13  ;;  %v1036_v31 = vrot.slane %v1015_v21, %v52_v12 }
   0x8   :  { %v1043_v35 = vrot.slane %v1015_v21, %v85_v13  ;;  %v1063_v58 = vrot.slane %v992_v14, %v118_v54  ;;  %v1067_v59 = vrot.slane %v992_v14, %v151_v55  ;;  %v1072_v61 = vrot.slane %v998_v17, %v118_v54 }
   0x9   :  { %v1075_v62 = vrot.slane %v1003_v18, %v118_v54  ;;  %v1078_v63 = vrot.slane %v1015_v21, %v118_v54  ;;  %v1088_v12 = vrot.slane %v1003_v18, %v151_v55  ;;  %vm243_vm5 = vcmp.lt.s32.totalorder %v985_v11, 112 }
   0xa   :  { %72 = vrot.lane.b32.xlu1 %v916_v3, %s850_s30  ;;  %70 = vrot.lane.b32.xlu0 %v902_v1, %s850_s30  ;;  %vm210_vm6 = vcmp.lt.s32.totalorder %v985_v11, 113  ;;  %vm276_vm7 = vcmp.lt.s32.totalorder %v985_v11, 111 }
   0xe   :  { %76 = vrot.lane.b32.xlu1 %v911_v2, %s850_s30  ;;  %74 = vrot.lane.b32.xlu0 %v897_v0, %s850_s30 }
  0x12   :  { %105 = vrot.lane.b32.xlu1 %v916_v3, %s851_s0  ;;  %103 = vrot.lane.b32.xlu0 %v902_v1, %s851_s0 }
  0x16   :  { %109 = vrot.lane.b32.xlu1 %v911_v2, %s851_s0  ;;  %107 = vrot.lane.b32.xlu0 %v897_v0, %s851_s0 }
  0x1a   :  { %138 = vrot.lane.b32.xlu1 %v916_v3, %s852_s7  ;;  %136 = vrot.lane.b32.xlu0 %v902_v1, %s852_s7 }
  0x1e   :  { %142 = vrot.lane.b32.xlu1 %v911_v2, %s852_s7  ;;  %140 = vrot.lane.b32.xlu0 %v897_v0, %s852_s7 }
  0x22   :  { %171 = vrot.lane.b32.xlu1 %v916_v3, %s853_s8  ;;  %169 = vrot.lane.b32.xlu0 %v902_v1, %s853_s8 }
  0x26   :  { %175 = vrot.lane.b32.xlu1 %v911_v2, %s853_s8  ;;  %173 = vrot.lane.b32.xlu0 %v897_v0, %s853_s8 }
  0x2a   :  { %204 = vrot.lane.b32.xlu1 %v916_v3, %s854_s9  ;;  %202 = vrot.lane.b32.xlu0 %v902_v1, %s854_s9 }
  0x2e   :  { %208 = vrot.lane.b32.xlu1 %v911_v2, %s854_s9  ;;  %206 = vrot.lane.b32.xlu0 %v897_v0, %s854_s9 }
  0x32   :  { %237 = vrot.lane.b32.xlu1 %v916_v3, %s855_s10  ;;  %235 = vrot.lane.b32.xlu0 %v902_v1, %s855_s10 }
  0x36   :  { %241 = vrot.lane.b32.xlu1 %v911_v2, %s855_s10  ;;  %239 = vrot.lane.b32.xlu0 %v897_v0, %s855_s10 }
  0x3a   :  { %270 = vrot.lane.b32.xlu1 %v916_v3, %s858_s11  ;;  %268 = vrot.lane.b32.xlu0 %v902_v1, %s858_s11 }
  0x3e   :  { %274 = vrot.lane.b32.xlu1 %v911_v2, %s858_s11  ;;  %272 = vrot.lane.b32.xlu0 %v897_v0, %s858_s11 }
  0x42   :  { %305 = vperm.xlu0 %848, %v302_v6  }
  0x74   :  { %v40_v9 = vpop.permute.xlu1 %39  ;;  %v36_v10 = vpop.permute.xlu0 %35 }
  0x78   :  { %v42_v15 = vpop.permute.xlu1 %41  ;;  %v38_v16 = vpop.permute.xlu0 %37 }
  0x79   :  { %v48_v22 = vsel %vm45_vm0, %v36_v10, %v38_v16  ;;  %v49_v28 = vsel %vm45_vm0, %v42_v15, %v36_v10  ;;  %v47_v32 = vsel %vm45_vm0, %v38_v16, %v40_v9  ;;  %v46_v36 = vsel %vm45_vm0, %v40_v9, %v42_v15 }
  0x7a   :  { %v67_v33 = vmul.f32 %v1007_v19, %v48_v22  ;;  %v66_v37 = vmul.f32 %v1020_v23, %v49_v28  ;;  %v68_v41 = vmul.f32 %v1023_v24, %v47_v32  ;;  %v69_v47 = vmul.f32 %v1036_v31, %v46_v36 }
  0x7b   :  { %v1085_v10 = vrot.slane %v998_v17, %v151_v55  ;;  %v1095_v22 = vrot.slane %v1015_v21, %v151_v55 }
  0x7c   :  { %v73_v25 = vpop.permute.xlu1 %72  ;;  %v71_v26 = vpop.permute.xlu0 %70 }
  0x7d   :  { %v81_v29 = vsel %vm78_vm1, %v71_v26, %v73_v25 }
  0x7e   :  { %v100_v34 = vmul.f32 %v1010_v20, %v81_v29 }
  0x80   :  { %v77_v38 = vpop.permute.xlu1 %76  ;;  %v75_v39 = vpop.permute.xlu0 %74  ;;  %v774_v40 = vpack.c.bf16 %v100_v34, %v67_v33  ;;  %v184_v33 = vsub.s32 5, %v983_v8 }
  0x81   :  { %v82_v42 = vsel %vm78_vm1, %v77_v38, %v71_v26  ;;  %v79_v43 = vsel %vm78_vm1, %v75_v39, %v77_v38  ;;  %v80_v44 = vsel %vm78_vm1, %v73_v25, %v75_v39 }
  0x82   :  { %v99_v45 = vmul.f32 %v1026_v27, %v82_v42  ;;  %v101_v46 = vmul.f32 %v1033_v30, %v80_v44  ;;  %775 = vmatprep.subr.bf16.mxu0 %v774_v40  ;;  %v102_v48 = vmul.f32 %v1043_v35, %v79_v43 }
  0x84   :  { %v106_v49 = vpop.permute.xlu1 %105  ;;  %v104_v50 = vpop.permute.xlu0 %103  ;;  %v776_v51 = vpack.c.bf16 %v99_v45, %v66_v37  ;;  %v790_v52 = vpack.c.bf16 %v102_v48, %v69_v47  ;;  %v792_v53 = vpack.c.bf16 %v101_v46, %v68_v41  ;;  %v1114_v48 = vrot.slane %v998_v17, %v184_v33 }
  0x85   :  { %v114_v60 = vsel %vm111_vm2, %v104_v50, %v106_v49 }
  0x86   :  { %777 = vmatpush1.bf16.msra.mxu0 %v776_v51  ;;  %791 = vmatprep.subr.bf16.mxu1 %v790_v52  ;;  %v133_v13 = vmul.f32 %v1063_v58, %v114_v60  ;;  %v1122_v51 = vrot.slane %v992_v14, %v184_v33  ;;  %v1125_v52 = vrot.slane %v1003_v18, %v184_v33 }
  0x87   :  { %793 = vmatpush1.bf16.msra.mxu1 %v792_v53 }
  0x88   :  { %v110_v56 = vpop.permute.xlu1 %109  ;;  %v108_v57 = vpop.permute.xlu0 %107 }
  0x89   :  { %v115_v7 = vsel %vm111_vm2, %v110_v56, %v104_v50  ;;  %v113_v15 = vsel %vm111_vm2, %v106_v49, %v108_v57  ;;  %v112_v25 = vsel %vm111_vm2, %v108_v57, %v110_v56  ;;  %v1117_v49 = vrot.slane %v1015_v21, %v184_v33 }
  0x8a   :  { %v132_v26 = vmul.f32 %v1072_v61, %v115_v7  ;;  %v134_v34 = vmul.f32 %v1075_v62, %v113_v15  ;;  %v135_v39 = vmul.f32 %v1078_v63, %v112_v25  ;;  %v217_v33 = vsub.s32 6, %v983_v8 }
  0x8c   :  { %v139_v5 = vpop.permute.xlu1 %138  ;;  %v137_v6 = vpop.permute.xlu0 %136 }
  0x8d   :  { %v147_v9 = vsel %vm144_vm3, %v137_v6, %v139_v5 }
  0x8e   :  { %v166_v16 = vmul.f32 %v1067_v59, %v147_v9 }
  0x90   :  { %v143_v28 = vpop.permute.xlu1 %142  ;;  %v141_v29 = vpop.permute.xlu0 %140  ;;  %v778_v32 = vpack.c.bf16 %v166_v16, %v133_v13 }
  0x91   :  { %v148_v36 = vsel %vm144_vm3, %v143_v28, %v137_v6  ;;  %v145_v37 = vsel %vm144_vm3, %v141_v29, %v143_v28  ;;  %v146_v38 = vsel %vm144_vm3, %v139_v5, %v141_v29 }
  0x92   :  { %v165_v40 = vmul.f32 %v1085_v10, %v148_v36  ;;  %v167_v41 = vmul.f32 %v1088_v12, %v146_v38  ;;  %v168_v42 = vmul.f32 %v1095_v22, %v145_v37  ;;  %779 = vmatprep.subr.bf16.mxu0 %v778_v32  ;;  %v250_v32 = vsub.s32 7, %v983_v8 }
  0x93   :  { %v1154_v36 = vrot.slane %v1003_v18, %v217_v33 }
  0x94   :  { %v172_v43 = vpop.permute.xlu1 %171  ;;  %v170_v44 = vpop.permute.xlu0 %169  ;;  %v780_v45 = vpack.c.bf16 %v165_v40, %v132_v26  ;;  %v794_v46 = vpack.c.bf16 %v168_v42, %v135_v39  ;;  %v796_v47 = vpack.c.bf16 %v167_v41, %v134_v34  ;;  %v1159_v37 = vrot.slane %v998_v17, %v250_v32 }
  0x95   :  { %v180_v50 = vsel %vm177_vm4, %v170_v44, %v172_v43  ;;  %v1164_v39 = vrot.slane %v1015_v21, %v250_v32  ;;  %v1167_v40 = vrot.slane %v992_v14, %v250_v32  ;;  %v1170_v41 = vrot.slane %v1003_v18, %v250_v32 }
  0x96   :  { %781 = vmatpush1.bf16.msra.mxu0 %v780_v45  ;;  %795 = vmatprep.subr.bf16.mxu1 %v794_v46  ;;  %v198_v55 = vmul.f32 %v1114_v48, %v180_v50  ;;  %v1173_v42 = vrot.slane %v998_v17, %v217_v33 }
  0x97   :  { %797 = vmatpush1.bf16.msra.mxu1 %v796_v47 }
  0x98   :  { %v176_v53 = vpop.permute.xlu1 %175  ;;  %v174_v54 = vpop.permute.xlu0 %173  ;;  %v784_v26 = vpack.c.bf16 %v198_v55, %v902_v1 }
  0x99   :  { %v181_v56 = vsel %vm177_vm4, %v176_v53, %v170_v44  ;;  %v178_v57 = vsel %vm177_vm4, %v174_v54, %v176_v53  ;;  %v179_v60 = vsel %vm177_vm4, %v172_v43, %v174_v54 }
  0x9a   :  { %v201_v5 = vmul.f32 %v1117_v49, %v181_v56  ;;  %v199_v6 = vmul.f32 %v1122_v51, %v179_v60  ;;  %v200_v7 = vmul.f32 %v1125_v52, %v178_v57 }
  0x9c   :  { %v205_v9 = vpop.permute.xlu1 %204  ;;  %v203_v13 = vpop.permute.xlu0 %202  ;;  %v782_v15 = vpack.c.bf16 %v199_v6, %v916_v3  ;;  %v798_v16 = vpack.c.bf16 %v201_v5, %v911_v2  ;;  %v800_v25 = vpack.c.bf16 %v200_v7, %v897_v0  ;;  %v1146_v2 = vrot.slane %v1015_v21, %v217_v33 }
  0x9d   :  { %v1149_v0 = vrot.slane %v992_v14, %v217_v33  ;;  %v213_v44 = vsel %vm210_vm6, %v203_v13, %v205_v9 }
  0x9e   :  { %783 = vmatprep.subr.bf16.mxu0 %v782_v15  ;;  %799 = vmatprep.subr.bf16.mxu1 %v798_v16  ;;  %v231_v57 = vmul.f32 %v1173_v42, %v213_v44  ;;  %v1197_v15 = vld [vmem:[%s1427_s5 + $0x38] ss:$0 sm:$0xff]  ;;  %v1202_v16 = vld [vmem:[%s1427_s5 + $0x28] ss:$0 sm:$0xff]  ;;  %v301_v44 = vld [vmem:[%s1428_s1] sm:$0xff] }
  0x9f   :  { %785 = vmatpush1.bf16.msra.mxu0 %v784_v26  ;;  %801 = vmatpush1.bf16.msra.mxu1 %v800_v25  ;;  %v1207_v25 = vld [vmem:[%s1427_s5 + $0x30] ss:$0 sm:$0xff]  ;;  %v1212_v26 = vld [vmem:[%s1427_s5 + $0x20] ss:$0 sm:$0xff] }
  0xa0   :  { %v209_v28 = vpop.permute.xlu1 %208  ;;  %v207_v29 = vpop.permute.xlu0 %206 }
  0xa1   :  { %v214_v34 = vsel %vm210_vm6, %v209_v28, %v203_v13  ;;  %v212_v8 = vsel %vm210_vm6, %v205_v9, %v207_v29  ;;  %v211_v43 = vsel %vm210_vm6, %v207_v29, %v209_v28 }
  0xa2   :  { %v234_v45 = vmul.f32 %v1146_v2, %v214_v34  ;;  %v232_v21 = vmul.f32 %v1149_v0, %v212_v8  ;;  %v233_v53 = vmul.f32 %v1154_v36, %v211_v43 }
  0xa4   :  { %v238_v1 = vpop.permute.xlu1 %237  ;;  %v236_v3 = vpop.permute.xlu0 %235 }
  0xa5   :  { %v246_v38 = vsel %vm243_vm5, %v236_v3, %v238_v1 }
  0xa6   :  { %v264_v14 = vmul.f32 %v1159_v37, %v246_v38 }
  0xa8   :  { %v242_v46 = vpop.permute.xlu1 %241  ;;  %v240_v47 = vpop.permute.xlu0 %239  ;;  %v788_v13 = vpack.c.bf16 %v264_v14, %v231_v57 }
  0xa9   :  { %v247_v18 = vsel %vm243_vm5, %v242_v46, %v236_v3  ;;  %v244_v17 = vsel %vm243_vm5, %v240_v47, %v242_v46  ;;  %v245_v50 = vsel %vm243_vm5, %v238_v1, %v240_v47 }
  0xaa   :  { %v267_v54 = vmul.f32 %v1164_v39, %v247_v18  ;;  %v265_v55 = vmul.f32 %v1167_v40, %v245_v50  ;;  %v266_v56 = vmul.f32 %v1170_v41, %v244_v17 }
  0xac   :  { %v271_v60 = vpop.permute.xlu1 %270  ;;  %v269_v5 = vpop.permute.xlu0 %268  ;;  %v786_v6 = vpack.c.bf16 %v265_v55, %v232_v21  ;;  %v802_v7 = vpack.c.bf16 %v267_v54, %v234_v45  ;;  %v804_v9 = vpack.c.bf16 %v266_v56, %v233_v53 }
  0xad   :  { %v279_v28 = vsel %vm276_vm7, %v269_v5, %v271_v60 }
  0xae   :  { %787 = vmatprep.subr.bf16.mxu0 %v786_v6  ;;  %803 = vmatprep.subr.bf16.mxu1 %v802_v7  ;;  %v297_v43 = vmul.f32 %v1212_v26, %v279_v28  ;;  %v595_v7 = vld [vmem:[%s1429_s4] sm:$0xff] }
  0xaf   :  { %789 = vmatpush1.bf16.msra.mxu0 %v788_v13  ;;  %805 = vmatpush1.bf16.msra.mxu1 %v804_v9 }
  0xb0   :  { %v275_v29 = vpop.permute.xlu1 %274  ;;  %v273_v32 = vpop.permute.xlu0 %272 }
  0xb1   :  { %v280_v33 = vsel %vm276_vm7, %v275_v29, %v269_v5  ;;  %v277_v1 = vsel %vm276_vm7, %v273_v32, %v275_v29  ;;  %v278_v3 = vsel %vm276_vm7, %v271_v60, %v273_v32 }
  0xb2   :  { %v300_v34 = vmul.f32 %v1197_v15, %v280_v33  ;;  %v298_v8 = vmul.f32 %v1202_v16, %v278_v3  ;;  %v299_v38 = vmul.f32 %v1207_v25, %v277_v1 }
  0xb4   :  { %328 = vmatprep.subr.mxu0 %v298_v8  ;;  %399 = vmatprep.subr.mxu1 %v300_v34 }
  0xb5   :  { %329 = vmatpush1.msra.mxu0 %v297_v43  ;;  %400 = vmatpush1.msra.mxu1 %v299_v38 }
  0xb6   :  { %770 = vmatmul.mubr.msk.f32.vlgmr.msra.gmra.mrb[0].mxu0 %vm308_vm8, %v301_v44  ;;  %771 = vmatmul.mubr.msk.f32.vlgmr.msra.gmra.mrb[0].mxu1 %vm308_vm8, %v301_v44 }
  0xb7   :  { %668 = vmatprep.mubr.f32.mxu0 %v856_v4  ;;  %739 = vmatprep.mubr.f32.mxu1 %v856_v4 }
  0xc1   :  { %v306_v45 = vpop.permute.xlu0 %305 }
 0x189   :  { %v378_v21 = vpop.f32.mrb[0].mxu0  ;;  %v449_v46 = vpop.f32.mrb[0].mxu1 }
 0x18a   :  { %v379_v47 = vadd.f32 %v378_v21, %v306_v45  ;;  %v450_v14 = vadd.f32 %v449_v46, %v306_v45  ;;  %v380_v18 = vpop.f32.mrb[1].mxu0  ;;  %v451_v17 = vpop.f32.mrb[1].mxu1 }
 0x18b   :  { %v381_v50 = vadd.f32 %v380_v18, %v306_v45  ;;  %v452_v60 = vadd.f32 %v451_v17, %v306_v45 }
 0x18c   :  { %vm454_vm9 = vcmp.ge.f32.partialorder %v379_v47, 0.0  ;;  %vm456_vm10 = vcmp.ge.f32.partialorder %v450_v14, 0.0  ;;  %v458_v53 = vmul.f32 0.2, %v379_v47  ;;  %v460_v54 = vmul.f32 0.2, %v450_v14 }
 0x18d   :  { %v459_v57 = vmul.f32 0.2, %v381_v50  ;;  %vm455_vm11 = vcmp.ge.f32.partialorder %v381_v50, 0.0  ;;  %v461_v5 = vmul.f32 0.2, %v452_v60  ;;  %vm457_vm12 = vcmp.ge.f32.partialorder %v452_v60, 0.0 }
 0x18e   :  { %v1233_v55 = vsel %vm454_vm9, %v379_v47, %v458_v53  ;;  %v1235_v56 = vsel %vm456_vm10, %v450_v14, %v460_v54 }
 0x18f   :  { %470 = vrot.lane.b32.xlu0 %v1235_v56, %s849_s25  ;;  %466 = vrot.lane.b32.xlu1 %v1233_v55, %s849_s25  ;;  %v1241_v4 = vsel %vm455_vm11, %v381_v50, %v459_v57  ;;  %v1247_v6 = vsel %vm457_vm12, %v452_v60, %v461_v5 }
 0x193   :  { %482 = vrot.lane.b32.xlu0 %v1233_v55, %s850_s30  ;;  %468 = vrot.lane.b32.xlu1 %v1241_v4, %s849_s25 }
 0x197   :  { %486 = vrot.lane.b32.xlu0 %v1235_v56, %s850_s30  ;;  %472 = vrot.lane.b32.xlu1 %v1247_v6, %s849_s25 }
 0x19b   :  { %498 = vrot.lane.b32.xlu0 %v1233_v55, %s851_s0  ;;  %484 = vrot.lane.b32.xlu1 %v1241_v4, %s850_s30 }
 0x19f   :  { %502 = vrot.lane.b32.xlu0 %v1235_v56, %s851_s0  ;;  %488 = vrot.lane.b32.xlu1 %v1247_v6, %s850_s30 }
 0x1a3   :  { %514 = vrot.lane.b32.xlu0 %v1233_v55, %s852_s7  ;;  %500 = vrot.lane.b32.xlu1 %v1241_v4, %s851_s0 }
 0x1a7   :  { %518 = vrot.lane.b32.xlu0 %v1235_v56, %s852_s7  ;;  %504 = vrot.lane.b32.xlu1 %v1247_v6, %s851_s0 }
 0x1ab   :  { %530 = vrot.lane.b32.xlu0 %v1233_v55, %s853_s8  ;;  %516 = vrot.lane.b32.xlu1 %v1241_v4, %s852_s7 }
 0x1af   :  { %534 = vrot.lane.b32.xlu0 %v1235_v56, %s853_s8  ;;  %520 = vrot.lane.b32.xlu1 %v1247_v6, %s852_s7 }
 0x1b3   :  { %546 = vrot.lane.b32.xlu0 %v1233_v55, %s854_s9  ;;  %532 = vrot.lane.b32.xlu1 %v1241_v4, %s853_s8 }
 0x1b7   :  { %550 = vrot.lane.b32.xlu0 %v1235_v56, %s854_s9  ;;  %536 = vrot.lane.b32.xlu1 %v1247_v6, %s853_s8 }
 0x1bb   :  { %562 = vrot.lane.b32.xlu0 %v1233_v55, %s855_s10  ;;  %548 = vrot.lane.b32.xlu1 %v1241_v4, %s854_s9 }
 0x1bf   :  { %566 = vrot.lane.b32.xlu0 %v1235_v56, %s855_s10  ;;  %552 = vrot.lane.b32.xlu1 %v1247_v6, %s854_s9 }
 0x1c3   :  { %578 = vrot.lane.b32.xlu0 %v1233_v55, %s858_s11  ;;  %564 = vrot.lane.b32.xlu1 %v1241_v4, %s855_s10 }
 0x1c7   :  { %582 = vrot.lane.b32.xlu0 %v1235_v56, %s858_s11  ;;  %568 = vrot.lane.b32.xlu1 %v1247_v6, %s855_s10 }
 0x1cb   :  { %598 = vperm.xlu0 %848, %v595_v7   ;;  %580 = vrot.lane.b32.xlu1 %v1241_v4, %s858_s11 }
 0x1cf   :  { %584 = vrot.lane.b32.xlu1 %v1247_v6, %s858_s11 }
 0x201   :  { %v471_v9 = vpop.permute.xlu0 %470  ;;  %v467_v13 = vpop.permute.xlu1 %466 }
 0x205   :  { %v483_v28 = vpop.permute.xlu0 %482  ;;  %v469_v29 = vpop.permute.xlu1 %468 }
 0x206   :  { %v476_v1 = vsel %vm45_vm0, %v467_v13, %v469_v29  ;;  %v475_v46 = vsel %vm45_vm0, %v469_v29, %v471_v9 }
 0x207   :  { %v479_v38 = vmul.f32 %v476_v1, %v1007_v19  ;;  %v480_v60 = vmul.f32 %v475_v46, %v1023_v24 }
 0x209   :  { %v487_v32 = vpop.permute.xlu0 %486  ;;  %v473_v33 = vpop.permute.xlu1 %472 }
 0x20a   :  { %v474_v45 = vsel %vm45_vm0, %v471_v9, %v473_v33  ;;  %v477_v21 = vsel %vm45_vm0, %v473_v33, %v467_v13 }
 0x20b   :  { %v478_v50 = vmul.f32 %v477_v21, %v1020_v23  ;;  %v481_v53 = vmul.f32 %v474_v45, %v1036_v31 }
 0x20d   :  { %v499_v3 = vpop.permute.xlu0 %498  ;;  %v485_v34 = vpop.permute.xlu1 %484 }
 0x20e   :  { %v492_v8 = vsel %vm78_vm1, %v483_v28, %v485_v34  ;;  %v491_v43 = vsel %vm78_vm1, %v485_v34, %v487_v32 }
 0x20f   :  { %v495_v44 = vmul.f32 %v492_v8, %v1010_v20  ;;  %v496_v17 = vmul.f32 %v491_v43, %v1033_v30 }
 0x211   :  { %v503_v47 = vpop.permute.xlu0 %502  ;;  %v489_v14 = vpop.permute.xlu1 %488  ;;  %v806_v18 = vpack.c.bf16 %v495_v44, %v479_v38  ;;  %v824_v13 = vpack.c.bf16 %v496_v17, %v480_v60 }
 0x212   :  { %v490_v19 = vsel %vm78_vm1, %v487_v32, %v489_v14  ;;  %v493_v20 = vsel %vm78_vm1, %v489_v14, %v483_v28 }
 0x213   :  { %v494_v54 = vmul.f32 %v493_v20, %v1026_v27  ;;  %v497_v57 = vmul.f32 %v490_v19, %v1043_v35  ;;  %807 = vmatprep.subr.bf16.mxu0 %v806_v18 }
 0x215   :  { %v808_v5 = vpack.c.bf16 %v494_v54, %v478_v50  ;;  %v515_v7 = vpop.permute.xlu0 %514  ;;  %v501_v30 = vpop.permute.xlu1 %500  ;;  %v822_v9 = vpack.c.bf16 %v497_v57, %v481_v53 }
 0x216   :  { %v508_v23 = vsel %vm111_vm2, %v499_v3, %v501_v30  ;;  %v507_v8 = vsel %vm111_vm2, %v501_v30, %v503_v47 }
 0x217   :  { %809 = vmatpush1.bf16.msra.mxu0 %v808_v5  ;;  %823 = vmatprep.subr.bf16.mxu1 %v822_v9  ;;  %v511_v24 = vmul.f32 %v508_v23, %v1063_v58 }
 0x218   :  { %825 = vmatpush1.bf16.msra.mxu1 %v824_v13 }
 0x219   :  { %v519_v28 = vpop.permute.xlu0 %518  ;;  %v505_v29 = vpop.permute.xlu1 %504 }
 0x21a   :  { %v506_v1 = vsel %vm111_vm2, %v503_v47, %v505_v29  ;;  %v509_v34 = vsel %vm111_vm2, %v505_v29, %v499_v3  ;;  %v512_v47 = vmul.f32 %v507_v8, %v1075_v62 }
 0x21b   :  { %v510_v21 = vmul.f32 %v509_v34, %v1072_v61  ;;  %v513_v46 = vmul.f32 %v506_v1, %v1078_v63 }
 0x21d   :  { %v531_v31 = vpop.permute.xlu0 %530  ;;  %v517_v27 = vpop.permute.xlu1 %516 }
 0x21e   :  { %v524_v35 = vsel %vm144_vm3, %v515_v7, %v517_v27  ;;  %v523_v32 = vsel %vm144_vm3, %v517_v27, %v519_v28 }
 0x21f   :  { %v527_v33 = vmul.f32 %v524_v35, %v1067_v59  ;;  %v528_v45 = vmul.f32 %v523_v32, %v1088_v12 }
 0x221   :  { %v535_v38 = vpop.permute.xlu0 %534  ;;  %v521_v43 = vpop.permute.xlu1 %520  ;;  %v810_v44 = vpack.c.bf16 %v527_v33, %v511_v24  ;;  %v828_v20 = vpack.c.bf16 %v528_v45, %v512_v47 }
 0x222   :  { %v522_v58 = vsel %vm144_vm3, %v519_v28, %v521_v43  ;;  %v525_v59 = vsel %vm144_vm3, %v521_v43, %v515_v7 }
 0x223   :  { %v526_v3 = vmul.f32 %v525_v59, %v1085_v10  ;;  %v529_v14 = vmul.f32 %v522_v58, %v1095_v22  ;;  %811 = vmatprep.subr.bf16.mxu0 %v810_v44 }
 0x225   :  { %v812_v18 = vpack.c.bf16 %v526_v3, %v510_v21  ;;  %v547_v17 = vpop.permute.xlu0 %546  ;;  %v533_v12 = vpop.permute.xlu1 %532  ;;  %v826_v19 = vpack.c.bf16 %v529_v14, %v513_v46 }
 0x226   :  { %v539_v50 = vsel %vm177_vm4, %v533_v12, %v535_v38  ;;  %v540_v61 = vsel %vm177_vm4, %v531_v31, %v533_v12 }
 0x227   :  { %v542_v63 = vmul.f32 %v540_v61, %v1114_v48  ;;  %v543_v10 = vmul.f32 %v539_v50, %v1122_v51  ;;  %813 = vmatpush1.bf16.msra.mxu0 %v812_v18  ;;  %827 = vmatprep.subr.bf16.mxu1 %v826_v19 }
 0x228   :  { %829 = vmatpush1.bf16.msra.mxu1 %v828_v20 }
 0x229   :  { %v816_v62 = vpack.c.bf16 %v542_v63, %v1233_v55  ;;  %v551_v22 = vpop.permute.xlu0 %550  ;;  %v537_v53 = vpop.permute.xlu1 %536  ;;  %v814_v54 = vpack.c.bf16 %v543_v10, %v1241_v4 }
 0x22a   :  { %v538_v57 = vsel %vm177_vm4, %v535_v38, %v537_v53  ;;  %v541_v60 = vsel %vm177_vm4, %v537_v53, %v531_v31 }
 0x22b   :  { %v544_v5 = vmul.f32 %v538_v57, %v1125_v52  ;;  %v545_v48 = vmul.f32 %v541_v60, %v1117_v49  ;;  %815 = vmatprep.subr.bf16.mxu0 %v814_v54 }
 0x22c   :  { %817 = vmatpush1.bf16.msra.mxu0 %v816_v62 }
 0x22d   :  { %v832_v51 = vpack.c.bf16 %v544_v5, %v1235_v56  ;;  %v563_v7 = vpop.permute.xlu0 %562  ;;  %v549_v55 = vpop.permute.xlu1 %548  ;;  %v830_v30 = vpack.c.bf16 %v545_v48, %v1247_v6 }
 0x22e   :  { %v555_v13 = vsel %vm210_vm6, %v549_v55, %v551_v22  ;;  %v556_v52 = vsel %vm210_vm6, %v547_v17, %v549_v55 }
 0x22f   :  { %831 = vmatprep.subr.bf16.mxu1 %v830_v30  ;;  %v558_v29 = vmul.f32 %v556_v52, %v1173_v42  ;;  %v559_v6 = vmul.f32 %v555_v13, %v1149_v0 }
 0x230   :  { %833 = vmatpush1.bf16.msra.mxu1 %v832_v51 }
 0x231   :  { %v567_v4 = vpop.permute.xlu0 %566  ;;  %v553_v9 = vpop.permute.xlu1 %552 }
 0x232   :  { %v554_v35 = vsel %vm210_vm6, %v551_v22, %v553_v9  ;;  %v557_v24 = vsel %vm210_vm6, %v553_v9, %v547_v17 }
 0x233   :  { %v560_v42 = vmul.f32 %v554_v35, %v1154_v36 }
 0x235   :  { %v565_v28 = vpop.permute.xlu1 %564  ;;  %v579_v23 = vpop.permute.xlu0 %578 }
 0x236   :  { %v571_v49 = vsel %vm243_vm5, %v565_v28, %v567_v4  ;;  %v572_v56 = vsel %vm243_vm5, %v563_v7, %v565_v28 }
 0x237   :  { %v574_v31 = vmul.f32 %v572_v56, %v1159_v37  ;;  %v575_v27 = vmul.f32 %v571_v49, %v1167_v40  ;;  %v561_v37 = vmul.f32 %v557_v24, %v1146_v2 }
 0x239   :  { %v820_v32 = vpack.c.bf16 %v574_v31, %v558_v29  ;;  %v569_v33 = vpop.permute.xlu1 %568  ;;  %v818_v1 = vpack.c.bf16 %v575_v27, %v559_v6  ;;  %v583_v38 = vpop.permute.xlu0 %582 }
 0x23a   :  { %v570_v34 = vsel %vm243_vm5, %v567_v4, %v569_v33  ;;  %v573_v0 = vsel %vm243_vm5, %v569_v33, %v563_v7 }
 0x23b   :  { %v576_v40 = vmul.f32 %v570_v34, %v1170_v41  ;;  %v577_v8 = vmul.f32 %v573_v0, %v1164_v39  ;;  %819 = vmatprep.subr.bf16.mxu0 %v818_v1  ;;  %v594_v39 = vld [vmem:[%s1430_s3] sm:$0xff] }
 0x23c   :  { %821 = vmatpush1.bf16.msra.mxu0 %v820_v32 }
 0x23d   :  { %v836_v43 = vpack.c.bf16 %v576_v40, %v560_v42  ;;  %v581_v44 = vpop.permute.xlu1 %580  ;;  %v834_v45 = vpack.c.bf16 %v577_v8, %v561_v37 }
 0x23e   :  { %v587_v58 = vsel %vm276_vm7, %v581_v44, %v583_v38  ;;  %v588_v59 = vsel %vm276_vm7, %v579_v23, %v581_v44 }
 0x23f   :  { %v590_v36 = vmul.f32 %v1212_v26, %v588_v59  ;;  %v591_v2 = vmul.f32 %v1202_v16, %v587_v58  ;;  %835 = vmatprep.subr.bf16.mxu1 %v834_v45 }
 0x240   :  { %837 = vmatpush1.bf16.msra.mxu1 %v836_v43 }
 0x241   :  { %620 = vmatprep.subr.mxu0 %v591_v2  ;;  %v585_v41 = vpop.permute.xlu1 %584 }
 0x242   :  { %v586_v21 = vsel %vm276_vm7, %v583_v38, %v585_v41  ;;  %v589_v46 = vsel %vm276_vm7, %v585_v41, %v579_v23  ;;  %621 = vmatpush1.msra.mxu0 %v590_v36 }
 0x243   :  { %v592_v3 = vmul.f32 %v1207_v25, %v586_v21  ;;  %v593_v26 = vmul.f32 %v1197_v15, %v589_v46  ;;  %772 = vmatmul.mubr.msk.f32.vlgmr.msra.gmra.mrb[2].mxu0 %vm308_vm8, %v594_v39 }
 0x245   :  { %691 = vmatprep.subr.mxu1 %v593_v26 }
 0x246   :  { %692 = vmatpush1.msra.mxu1 %v592_v3 }
 0x247   :  { %773 = vmatmul.mubr.msk.f32.vlgmr.msra.gmra.mrb[2].mxu1 %vm308_vm8, %v594_v39 }
 0x24a   :  { %v599_v16 = vpop.permute.xlu0 %598 }
 0x316   :  { %v670_v14 = vpop.f32.mrb[2].mxu0 }
 0x317   :  { %v671_v47 = vadd.f32 %v670_v14, %v599_v16  ;;  %v672_v18 = vpop.f32.mrb[3].mxu0 }
 0x318   :  { %v673_v17 = vadd.f32 %v672_v18, %v599_v16 }
 0x319   :  { %vm746_vm13 = vcmp.ge.f32.partialorder %v671_v47, 0.0  ;;  %v750_v12 = vmul.f32 0.2, %v671_v47 }
 0x31a   :  { %vm747_vm14 = vcmp.ge.f32.partialorder %v673_v17, 0.0  ;;  %v751_v11 = vmul.f32 0.2, %v673_v17  ;;  %v741_v19 = vpop.f32.mrb[2].mxu1 }
 0x31b   :  { %v754_v20 = vsel %vm746_vm13, %v671_v47, %v750_v12  ;;  %v742_v25 = vadd.f32 %v741_v19, %v599_v16  ;;  %v743_v50 = vpop.f32.mrb[3].mxu1 }
 0x31c   :  { %758 = vst [vmem:[%s1431_s6] sm:$0xff] %v754_v20  ;;  %v755_v15 = vsel %vm747_vm14, %v673_v17, %v751_v11  ;;  %v744_v61 = vadd.f32 %v743_v50, %v599_v16 }
 0x31d   :  { %759 = vst [vmem:[%s1431_s6 + $0x8] sm:$0xff] %v755_v15  ;;  %vm748_vm15 = vcmp.ge.f32.partialorder %v742_v25, 0.0  ;;  %v752_v63 = vmul.f32 0.2, %v742_v25 }
 0x31e   :  { %vm749_vm0 = vcmp.ge.f32.partialorder %v744_v61, 0.0  ;;  %v753_v10 = vmul.f32 0.2, %v744_v61 }
 0x31f   :  { %v756_v62 = vsel %vm748_vm15, %v742_v25, %v752_v63 }
 0x320   :  { %760 = vst [vmem:[%s1431_s6 + $0x10] sm:$0xff] %v756_v62  ;;  %v757_v22 = vsel %vm749_vm0, %v744_v61, %v753_v10 }
 0x321   :  { %761 = vst [vmem:[%s1431_s6 + $0x18] sm:$0xff] %v757_v22 }

</bundles_post_ra>
